<compile_context>
chip_gen: v7x
topology: tpu7x:2x2x1
jax: 0.10.0
libtpu: 0.0.40
codegen_flags: <defaults>
</compile_context>

<pallas_src>
import math
import functools

import jax
import jax.numpy as jnp
from jax.experimental import pallas as pl
from jax.experimental.pallas import tpu as pltpu


def make_positional_encoding_table(num_mfcc_feature: int, max_len: int = 5000):
    """Deterministic buffer construction, identical to the PyTorch __init__."""
    position = jnp.arange(max_len, dtype=jnp.float32)[:, None]            # (max_len, 1)
    div_term = jnp.exp(
        jnp.arange(0, num_mfcc_feature, 2, dtype=jnp.float32)
        * (-math.log(10000.0) / num_mfcc_feature)
    )                                                                      # (D/2,)
    pe = jnp.zeros((max_len, 1, num_mfcc_feature), jnp.float32)
    pe = pe.at[:, 0, 0::2].set(jnp.sin(position * div_term))
    pe = pe.at[:, 0, 1::2].set(jnp.cos(position * div_term))
    return pe


def _pe_add_kernel(x_ref, pe_ref, o_ref):
    # eval / p == 0 path: pure add, no PRNG input or mask work compiled in.
    o_ref[...] = (x_ref[...] + pe_ref[...]).astype(o_ref.dtype)


def _pe_add_dropout_kernel(x_ref, pe_ref, bits_ref, o_ref, *,
                           keep_threshold: int, inv_keep: float):
    # x_ref:(TS,B,D)  pe_ref:(TS,1,D)  bits_ref:(TS,B,D) uint32
    x = x_ref[...]
    y = x + pe_ref[...]                       # broadcast pe over the batch (sublane) dim
    # Inverted dropout with an integer-threshold compare:
    #   keep  <=>  bits >= round(p * 2^32)   (P(keep) = 1 - p)
    keep = bits_ref[...] >= jnp.uint32(keep_threshold)
    scale = jnp.asarray(inv_keep, dtype=y.dtype)
    y = jnp.where(keep, y * scale, jnp.zeros_like(y))
    o_ref[...] = y.astype(o_ref.dtype)


def _pick_tile_rows(S: int, B: int, D: int, dtype, target_bytes: int = 1 << 20) -> int:
    """Rows of the seq axis per tile so one x tile is ~1 MiB (VMEM-budget safe
    with double-buffered x/bits/out on every TPU generation)."""
    row_bytes = B * D * jnp.dtype(dtype).itemsize
    rows = max(1, target_bytes // row_bytes)
    if rows >= 8:
        rows = (rows // 8) * 8
    return int(min(rows, S))


def positional_encoding_forward(x, pe, *, p: float = 0.1, training: bool = True,
                                rng_key=None):
    """x: (seq_len, batch, D); pe: (max_len, 1, D). Returns same shape/dtype as x."""
    S, B, D = x.shape
    pe_slice = pe[:S].astype(x.dtype)                     # (S, 1, D), same dtype as x

    TS = _pick_tile_rows(S, B, D, x.dtype)
    grid = (pl.cdiv(S, TS),)

    x_spec = pl.BlockSpec((TS, B, D), lambda i: (i, 0, 0))
    pe_spec = pl.BlockSpec((TS, 1, D), lambda i: (i, 0, 0))
    out_spec = pl.BlockSpec((TS, B, D), lambda i: (i, 0, 0))
    cparams = pltpu.CompilerParams(dimension_semantics=("parallel",))
    out_shape = jax.ShapeDtypeStruct((S, B, D), x.dtype)

    apply_dropout = training and p > 0.0
    if not apply_dropout:
        return pl.pallas_call(
            _pe_add_kernel,
            out_shape=out_shape,
            grid=grid,
            in_specs=[x_spec, pe_spec],
            out_specs=out_spec,
            compiler_params=cparams,
        )(x, pe_slice)

    if not (0.0 <= p < 1.0):
        raise ValueError(f"dropout p must be in [0, 1), got {p}")
    if rng_key is None:
        rng_key = jax.random.PRNGKey(0)

    bits = jax.random.bits(rng_key, (S, B, D), dtype=jnp.uint32)
    bits_spec = pl.BlockSpec((TS, B, D), lambda i: (i, 0, 0))

    keep_threshold = min(int(round(p * float(1 << 32))), (1 << 32) - 1)
    kernel = functools.partial(
        _pe_add_dropout_kernel,
        keep_threshold=keep_threshold,
        inv_keep=1.0 / (1.0 - p),
    )

    return pl.pallas_call(
        kernel,
        out_shape=out_shape,
        grid=grid,
        in_specs=[x_spec, pe_spec, bits_spec],
        out_specs=out_spec,
        compiler_params=cparams,
    )(x, pe_slice, bits)


if __name__ == "__main__":
    SEQ, BATCH, D_MODEL = 8, 2, 32       # small shapes consistent with the module's forward
    MAX_LEN = 64
    P_DROP = 0.1

    key = jax.random.PRNGKey(0)
    kx, kdrop = jax.random.split(key)
    x = jax.random.normal(kx, (SEQ, BATCH, D_MODEL), dtype=jnp.float32)
    pe = make_positional_encoding_table(D_MODEL, max_len=MAX_LEN)

    # Train-mode forward (dropout active, deterministic key).
    out_train = positional_encoding_forward(x, pe, p=P_DROP, training=True, rng_key=kdrop)
    out_train = jax.block_until_ready(out_train)
    assert out_train.shape == (SEQ, BATCH, D_MODEL)

    # Eval-mode forward (dropout is identity) — check against pure-JAX reference.
    out_eval = positional_encoding_forward(x, pe, p=P_DROP, training=False)
    out_eval = jax.block_until_ready(out_eval)
    ref_eval = x + pe[:SEQ]
    assert jnp.allclose(out_eval, ref_eval, atol=1e-6, rtol=1e-6)

    # Every trained element must be either dropped (0) or scaled by 1/(1-p).
    scaled_ref = ref_eval / (1.0 - P_DROP)
    ok = jnp.isclose(out_train, scaled_ref, atol=1e-5) | jnp.isclose(out_train, 0.0, atol=1e-7)
    assert bool(jnp.all(ok))

    print("KERNEL_OK")
</pallas_src>

<mosaic_0001>
module attributes {stable_mosaic.version = 11 : i64} {
  func.func @_pe_add_dropout_kernel(%arg0: i32, %arg1: memref<8x2x32xf32, #tpu.memory_space<vmem>>, %arg2: memref<8x1x32xf32, #tpu.memory_space<vmem>>, %arg3: memref<8x2x32xi32, #tpu.memory_space<vmem>>, %arg4: memref<8x2x32xf32, #tpu.memory_space<vmem>>) attributes {dimension_semantics = [#tpu.dimension_semantics<parallel>], iteration_bounds = array<i64: 1>, scalar_prefetch = 0 : i64, scratch_operands = 0 : i64, tpu.core_type = #tpu.core_type<tc>, window_params = [{transform_indices = @transform_0, window_bounds = array<i64: 8, 2, 32>}, {transform_indices = @transform_1, window_bounds = array<i64: 8, 1, 32>}, {transform_indices = @transform_2, window_bounds = array<i64: 8, 2, 32>}, {transform_indices = @transform_3, window_bounds = array<i64: 8, 2, 32>}]} {
    %c0 = arith.constant 0 : index
    %c0_0 = arith.constant 0 : index
    %c0_1 = arith.constant 0 : index
    %0 = vector.load %arg1[%c0, %c0_0, %c0_1] : memref<8x2x32xf32, #tpu.memory_space<vmem>>, vector<8x2x32xf32>
    %c0_2 = arith.constant 0 : index
    %c0_3 = arith.constant 0 : index
    %c0_4 = arith.constant 0 : index
    %1 = vector.load %arg2[%c0_2, %c0_3, %c0_4] : memref<8x1x32xf32, #tpu.memory_space<vmem>>, vector<8x1x32xf32>
    %2 = vector.broadcast %1 : vector<8x1x32xf32> to vector<8x2x32xf32>
    %3 = arith.addf %0, %2 : vector<8x2x32xf32>
    %c0_5 = arith.constant 0 : index
    %c0_6 = arith.constant 0 : index
    %c0_7 = arith.constant 0 : index
    %4 = vector.load %arg3[%c0_5, %c0_6, %c0_7] : memref<8x2x32xi32, #tpu.memory_space<vmem>>, vector<8x2x32xi32>
    %c429496730_i32 = arith.constant 429496730 : i32
    %5 = vector.broadcast %c429496730_i32 : i32 to vector<8x2x32xi32>
    %6 = arith.cmpi uge, %4, %5 : vector<8x2x32xi32>
    %cst = arith.constant 1.11111116 : f32
    %7 = vector.broadcast %cst : f32 to vector<8x2x32xf32>
    %8 = arith.mulf %3, %7 : vector<8x2x32xf32>
    %cst_8 = arith.constant 0.000000e+00 : f32
    %9 = vector.broadcast %cst_8 : f32 to vector<8x2x32xf32>
    %10 = arith.select %6, %8, %9 : vector<8x2x32xi1>, vector<8x2x32xf32>
    %c0_9 = arith.constant 0 : index
    %c0_10 = arith.constant 0 : index
    %c0_11 = arith.constant 0 : index
    %11 = vector.load %arg4[%c0_9, %c0_10, %c0_11] : memref<8x2x32xf32, #tpu.memory_space<vmem>>, vector<8x2x32xf32>
    tpu.vector_store %arg4[%c0_9, %c0_10, %c0_11], %10 {strides = array<i32>} : memref<8x2x32xf32, #tpu.memory_space<vmem>>, vector<8x2x32xf32>,
    return
  }
  func.func @transform_0(%arg0: i32) -> (i32, i32, i32) {
    %c0_i32 = arith.constant 0 : i32
    %c0_i32_0 = arith.constant 0 : i32
    %c0_i32_1 = arith.constant 0 : i32
    return %arg0, %c0_i32, %c0_i32_0 : i32, i32, i32
  }
  func.func @transform_1(%arg0: i32) -> (i32, i32, i32) {
    %c0_i32 = arith.constant 0 : i32
    %c0_i32_0 = arith.constant 0 : i32
    %c0_i32_1 = arith.constant 0 : i32
    return %arg0, %c0_i32, %c0_i32_0 : i32, i32, i32
  }
  func.func @transform_2(%arg0: i32) -> (i32, i32, i32) {
    %c0_i32 = arith.constant 0 : i32
    %c0_i32_0 = arith.constant 0 : i32
    %c0_i32_1 = arith.constant 0 : i32
    return %arg0, %c0_i32, %c0_i32_0 : i32, i32, i32
  }
  func.func @transform_3(%arg0: i32) -> (i32, i32, i32) {
    %c0_i32 = arith.constant 0 : i32
    %c0_i32_0 = arith.constant 0 : i32
    %c0_i32_1 = arith.constant 0 : i32
    return %arg0, %c0_i32, %c0_i32_0 : i32, i32, i32
  }
}

</mosaic_0001>

<bundles_post_ra>
// kernel: tpu_custom_call.1
= control target key start
LH: loop header
LB: loop body
LE: loop exit
PB: predicated region body
PF: predicated region fallthrough
CT: control target
= control target key end

     0   :  { %8 = vsyncpa [#allocation3], 0  ;;  %s390_s0 = inlined_call_operand.hbm [shape: f32[8,2,32], index: 0, kind: input, shape index: {}]   ;;  %s391_s1 = inlined_call_operand.hbm [shape: f32[8,1,32], index: 1, kind: input, shape index: {}]   ;;  %s392_s2 = inlined_call_operand.hbm [shape: u32[8,2,32], index: 2, kind: input, shape index: {}]   ;;  %s393_s3 = inlined_call_operand.hbm [shape: f32[8,2,32], index: 3, kind: output, shape index: {}]  }
   0x1   :  { %9 = vsyncpa [#allocation6], 0 }
   0x2   :  { %10 = vsyncpa [#allocation4], 0  ;;  %s297_s12 = smov [#allocation5]   ;;  %s203_s16 = scalar_lea.hbm %s391_s1, 128 }
   0x3   :  { %s28_s13 = sshll.u32 %s297_s12, 4  ;;  %p204_p0 = scmp.ne.s32.totalorder %s391_s1, %s203_s16  ;;  %s29_s13 = int_to_ptr.vmem [resolvable:$true] %s28_s13 }
   0x4   :  { %p207_p1 = scmp.lt.u32.totalorder %s203_s16, %s391_s1 }
   0x6   :  { %p209_p2 = pnand %p207_p1, %p204_p0 }
   0x8   :  { %212 = shalt.err (!%p209_p2)
}
   0x9   :  { %s213_s21 = scalar_lea.vmem %s29_s13, 128  ;;  %p218_p4 = scmp.lt.s32.totalorder %s29_s13, %s29_s13 }
   0xa   :  { %p214_p3 = scmp.ne.s32.totalorder %s29_s13, %s213_s21  ;;  %p219_p5 = scmp.lt.s32.totalorder %s213_s21, %s213_s21 }
   0xc   :  { %p220_p6 = por %p219_p5, %p218_p4 }
   0xe   :  { %p221_p7 = pnand %p220_p6, %p214_p3 }
  0x10   :  { %224 = shalt.err (!%p221_p7)
}
  0x11   :  { %s298_s22 = smov 16   ;;  %s299_s23 = smov 1  }
  0x12   :  { %34 = dma.hbm_to_vmem [thread:$0]  %s391_s1, 128, %s29_s13, [#allocation6], %s298_s22, %s298_s22, %s299_s23  }
  0x13   :  { %s300_s26 = smov [#allocation2]   ;;  %s225_s30 = scalar_lea.hbm %s390_s0, 256 }
  0x14   :  { %s16_s27 = sshll.u32 %s300_s26, 4  ;;  %p226_p8 = scmp.ne.s32.totalorder %s390_s0, %s225_s30  ;;  %s17_s27 = int_to_ptr.vmem [resolvable:$true] %s16_s27 }
  0x15   :  { %p229_p9 = scmp.lt.u32.totalorder %s225_s30, %s390_s0 }
  0x17   :  { %p231_p10 = pnand %p229_p9, %p226_p8 }
  0x19   :  { %234 = shalt.err (!%p231_p10)
}
  0x1a   :  { %s235_s8 = scalar_lea.vmem %s17_s27, 256  ;;  %p240_p12 = scmp.lt.s32.totalorder %s17_s27, %s17_s27 }
  0x1b   :  { %p236_p11 = scmp.ne.s32.totalorder %s17_s27, %s235_s8  ;;  %p241_p13 = scmp.lt.s32.totalorder %s235_s8, %s235_s8 }
  0x1d   :  { %p242_p0 = por %p241_p13, %p240_p12 }
  0x1f   :  { %p243_p1 = pnand %p242_p0, %p236_p11 }
  0x21   :  { %246 = shalt.err (!%p243_p1)
}
  0x22   :  { %s301_s1 = smov 32   ;;  %s302_s9 = smov 2  }
  0x23   :  { %22 = dma.hbm_to_vmem [thread:$0]  %s390_s0, 256, %s17_s27, [#allocation3], %s301_s1, %s301_s1, %s302_s9  }
  0x24   :  { %s303_s12 = smov [#allocation7]   ;;  %s247_s16 = scalar_lea.hbm %s392_s2, 256 }
  0x25   :  { %s40_s13 = sshll.u32 %s303_s12, 4  ;;  %p248_p2 = scmp.ne.s32.totalorder %s392_s2, %s247_s16  ;;  %s41_s13 = int_to_ptr.vmem [resolvable:$true] %s40_s13 }
  0x26   :  { %p251_p3 = scmp.lt.u32.totalorder %s247_s16, %s392_s2 }
  0x28   :  { %p253_p4 = pnand %p251_p3, %p248_p2 }
  0x2a   :  { %256 = shalt.err (!%p253_p4)
}
  0x2b   :  { %s257_s21 = scalar_lea.vmem %s41_s13, 256  ;;  %p262_p6 = scmp.lt.s32.totalorder %s41_s13, %s41_s13 }
  0x2c   :  { %p258_p5 = scmp.ne.s32.totalorder %s41_s13, %s257_s21  ;;  %p263_p7 = scmp.lt.s32.totalorder %s257_s21, %s257_s21 }
  0x2e   :  { %p264_p8 = por %p263_p7, %p262_p6 }
  0x30   :  { %p265_p9 = pnand %p264_p8, %p258_p5 }
  0x32   :  { %268 = shalt.err (!%p265_p9)
}
  0x33   :  { %46 = dma.hbm_to_vmem [thread:$0]  %s392_s2, 256, %s41_s13, [#allocation6], %s301_s1, %s301_s1, %s302_s9  }
  0x34   :  { %291 = dma.done.wait [#allocation3], 256  }
  0x35   :  { %292 = vsyncadd [#allocation3], 4294967040 }
  0x36   :  { %293 = dma.done.wait [#allocation6], 384  }
  0x37   :  { %294 = vsyncadd [#allocation6], 4294966912  ;;  %vm160_vm0 = vcmask 254976   ;;  %v56_v0 = vld [vmem:[#allocation2] sm:$0x3]  ;;  %s304_s2 = smov [#allocation8]  }
  0x38   :  { %v187_v1 = vld [vmem:[#allocation5] ss:$0 sm:$0xff]  ;;  %v128_v2 = vld [vmem:[#allocation7] sm:$0x3]  ;;  %v57_v4 = vld [vmem:[#allocation2 + $0x2] sm:$0x3] }
  0x39   :  { %v120_v3 = vadd.f32 %v187_v1, %v56_v0  ;;  %vm136_vm1 = vcmp.ge.u32.totalorder %v128_v2, 429496730  ;;  %v188_v5 = vld [vmem:[#allocation5 + $0x1] ss:$0 sm:$0xff]  ;;  %v129_v7 = vld [vmem:[#allocation7 + $0x2] sm:$0x3] }
  0x3a   :  { %v121_v6 = vadd.f32 %v188_v5, %v57_v4  ;;  %v58_v8 = vld [vmem:[#allocation2 + $0x4] sm:$0x3]  ;;  %v189_v9 = vld [vmem:[#allocation5 + $0x2] ss:$0 sm:$0xff]  ;;  %vm137_vm2 = vcmp.ge.u32.totalorder %v129_v7, 429496730 }
  0x3b   :  { %v144_v10 = vmul.f32 1.1111112, %v120_v3  ;;  %v122_v11 = vadd.f32 %v189_v9, %v58_v8  ;;  %v130_v12 = vld [vmem:[#allocation7 + $0x4] sm:$0x3]  ;;  %v59_v14 = vld [vmem:[#allocation2 + $0x6] sm:$0x3] }
  0x3c   :  { %v145_v13 = vmul.f32 1.1111112, %v121_v6  ;;  %vm138_vm3 = vcmp.ge.u32.totalorder %v130_v12, 429496730  ;;  %v190_v17 = vld [vmem:[#allocation5 + $0x3] ss:$0 sm:$0xff] }
  0x3d   :  { %v152_v15 = vsel %vm136_vm1, %v144_v10, 0.0  ;;  %v146_v16 = vmul.f32 1.1111112, %v122_v11  ;;  %v123_v19 = vadd.f32 %v190_v17, %v59_v14  ;;  %v131_v20 = vld [vmem:[#allocation7 + $0x6] sm:$0x3]  ;;  %s174_s23 = sshll.u32 %s304_s2, 4  ;;  %s175_s23 = int_to_ptr.vmem [resolvable:$true] %s174_s23 }
  0x3e   :  { %161 = vst.msk [vmem:[#allocation8] sm:$0x3] %vm160_vm0, %v152_v15  ;;  %v153_v18 = vsel %vm137_vm2, %v145_v13, 0.0  ;;  %v60_v21 = vld [vmem:[#allocation2 + $0x8] sm:$0x3]  ;;  %s269_s24 = scalar_lea.vmem %s175_s23, 256  ;;  %p274_p11 = scmp.lt.s32.totalorder %s175_s23, %s175_s23 }
  0x3f   :  { %162 = vst.msk [vmem:[#allocation8 + $0x2] sm:$0x3] %vm160_vm0, %v153_v18  ;;  %v154_v22 = vsel %vm138_vm3, %v146_v16, 0.0  ;;  %vm139_vm4 = vcmp.ge.u32.totalorder %v131_v20, 429496730  ;;  %p270_p10 = scmp.ne.s32.totalorder %s175_s23, %s269_s24  ;;  %p275_p12 = scmp.lt.s32.totalorder %s269_s24, %s269_s24 }
  0x40   :  { %v191_v23 = vld [vmem:[#allocation5 + $0x4] ss:$0 sm:$0xff]  ;;  %163 = vst.msk [vmem:[#allocation8 + $0x4] sm:$0x3] %vm160_vm0, %v154_v22  ;;  %v147_v24 = vmul.f32 1.1111112, %v123_v19 }
  0x41   :  { %v124_v25 = vadd.f32 %v191_v23, %v60_v21  ;;  %v132_v26 = vld [vmem:[#allocation7 + $0x8] sm:$0x3]  ;;  %v61_v27 = vld [vmem:[#allocation2 + $0xa] sm:$0x3]  ;;  %v192_v28 = vld [vmem:[#allocation5 + $0x5] ss:$0 sm:$0xff]  ;;  %p276_p13 = por %p275_p12, %p274_p11 }
  0x42   :  { %vm140_vm5 = vcmp.ge.u32.totalorder %v132_v26, 429496730  ;;  %v133_v29 = vld [vmem:[#allocation7 + $0xa] sm:$0x3]  ;;  %v155_v30 = vsel %vm139_vm4, %v147_v24, 0.0  ;;  %v125_v32 = vadd.f32 %v192_v28, %v61_v27 }
  0x43   :  { %v148_v31 = vmul.f32 1.1111112, %v124_v25  ;;  %vm141_vm6 = vcmp.ge.u32.totalorder %v133_v29, 429496730  ;;  %164 = vst.msk [vmem:[#allocation8 + $0x6] sm:$0x3] %vm160_vm0, %v155_v30  ;;  %p277_p0 = pnand %p276_p13, %p270_p10 }
  0x44   :  { %v62_v33 = vld [vmem:[#allocation2 + $0xc] sm:$0x3]  ;;  %v193_v34 = vld [vmem:[#allocation5 + $0x6] ss:$0 sm:$0xff]  ;;  %v134_v35 = vld [vmem:[#allocation7 + $0xc] sm:$0x3] }
  0x45   :  { %v156_v36 = vsel %vm140_vm5, %v148_v31, 0.0  ;;  %v149_v37 = vmul.f32 1.1111112, %v125_v32  ;;  %v126_v38 = vadd.f32 %v193_v34, %v62_v33  ;;  %vm142_vm7 = vcmp.ge.u32.totalorder %v134_v35, 429496730 }
  0x46   :  { %165 = vst.msk [vmem:[#allocation8 + $0x8] sm:$0x3] %vm160_vm0, %v156_v36  ;;  %v63_v39 = vld [vmem:[#allocation2 + $0xe] sm:$0x3]  ;;  %v194_v40 = vld [vmem:[#allocation5 + $0x7] ss:$0 sm:$0xff] }
  0x47   :  { %v135_v41 = vld [vmem:[#allocation7 + $0xe] sm:$0x3]  ;;  %v157_v42 = vsel %vm141_vm6, %v149_v37, 0.0  ;;  %v150_v43 = vmul.f32 1.1111112, %v126_v38  ;;  %v127_v44 = vadd.f32 %v194_v40, %v63_v39 }
  0x48   :  { %166 = vst.msk [vmem:[#allocation8 + $0xa] sm:$0x3] %vm160_vm0, %v157_v42  ;;  %vm143_vm8 = vcmp.ge.u32.totalorder %v135_v41, 429496730 }
  0x49   :  { %v158_v45 = vsel %vm142_vm7, %v150_v43, 0.0  ;;  %v151_v46 = vmul.f32 1.1111112, %v127_v44 }
  0x4a   :  { %167 = vst.msk [vmem:[#allocation8 + $0xc] sm:$0x3] %vm160_vm0, %v158_v45 }
  0x4b   :  { %v159_v47 = vsel %vm143_vm8, %v151_v46, 0.0 }
  0x4c   :  { %168 = vst.msk [vmem:[#allocation8 + $0xe] sm:$0x3] %vm160_vm0, %v159_v47 }
  0x4d   :  { %280 = shalt.err (!%p277_p0)
}
  0x4e   :  { %s281_s27 = scalar_lea.hbm %s393_s3, 256 }
  0x4f   :  { %p282_p1 = scmp.ne.s32.totalorder %s393_s3, %s281_s27  ;;  %p285_p2 = scmp.lt.u32.totalorder %s281_s27, %s393_s3 }
  0x51   :  { %p287_p3 = pnand %p285_p2, %p282_p1 }
  0x53   :  { %290 = shalt.err (!%p287_p3)
}
  0x54   :  { %180 = dma.vmem_to_hbm [thread:$0]  %s175_s23, 256, %s393_s3, [#allocation4], %s301_s1, %s301_s1, %s302_s9  }
  0x55   :  { %295 = dma.done.wait [#allocation4], 256  }
  0x56   :  { %296 = vsyncadd [#allocation4], 4294967040 }
  0x57   :  { %184 = vsyncpa [#allocation3], 1 }
  0x58   :  { %185 = vsyncpa [#allocation6], 1 }
  0x59   :  { %186 = vsyncpa [#allocation4], 1 }

</bundles_post_ra>
